<compile_context>
chip_gen: v6e
topology: v6e:2x2x1
jax: 0.10.0
libtpu: 0.0.40
codegen_flags: <defaults>
</compile_context>

<pallas_src>
import functools

import jax
import jax.numpy as jnp
from jax.experimental import pallas as pl
from jax.experimental.pallas import tpu as pltpu


def _round_up(x, m):
    return (x + m - 1) // m * m


def _gated_conv_kernel(x_cur_ref, x_halo_ref, w_ref, b_ref, o_ref, xcat_ref,
                       *, kh, kw, wp):
    """One (image, L-tile) step of the fused gated conv.

    x_cur_ref : (1, Cin_p, L_tile)        input columns [t*L_tile, (t+1)*L_tile)
    x_halo_ref: (1, Cin_p, halo_blk)      the next halo_blk columns (conv halo)
    w_ref     : (2*Cout_p, Kh*Kw*Cin_p)   fused feat+gate weights (resident)
    b_ref     : (2*Cout_p, 1)             fused feat+gate bias
    o_ref     : (1, Cout_p, L_tile)       gated output (lane-dense)
    xcat_ref  : (Kh*Kw*Cin_p, L_tile)     scratch: stacked shifted input views
    """
    cin_p = x_cur_ref.shape[1]
    cout_p = o_ref.shape[1]
    l_tile = o_ref.shape[2]

    # Pack the Kh*Kw shifted views into one operand so the conv becomes a
    # single K = Kh*Kw*Cin_p matmul.  All offsets are static.
    for i in range(kh):
        for j in range(kw):
            s = i * wp + j                                 # lane shift of this tap
            rows = pl.ds((i * kw + j) * cin_p, cin_p)
            n_cur = l_tile - s                             # columns from this tile
            if n_cur > 0:
                xcat_ref[rows, pl.ds(0, n_cur)] = x_cur_ref[0, :, pl.ds(s, n_cur)]
            if s > 0:                                      # columns from the halo
                xcat_ref[rows, pl.ds(n_cur, s)] = x_halo_ref[0, :, pl.ds(0, s)]

    # One fused matmul for feat+gate; bias folded into the same add.
    acc = jnp.dot(w_ref[...], xcat_ref[...],
                  preferred_element_type=jnp.float32) + b_ref[...]

    # feat/gate split: static sublane slice at Cout_p (multiple of 8) -> free.
    feat = acc[:cout_p]
    gate = acc[cout_p:]

    # ELU (alpha=1): exp only ever sees non-positive inputs (no inf in the
    # discarded branch).  Sigmoid as a single EUP tanh.
    feat = jnp.where(feat > 0, feat, jnp.exp(jnp.minimum(feat, 0.0)) - 1.0)
    gate = 0.5 * jnp.tanh(0.5 * gate) + 0.5

    o_ref[0] = (feat * gate).astype(o_ref.dtype)


def simple_gated_conv_module(x_nchw, weight, bias, *, padding=1,
                             l_tile_target=2048, mxu_dtype=jnp.float32):
    """SimpleGatedConvModule forward: ELU(conv_f(x)) * sigmoid(conv_g(x)).

    Args:
      x_nchw : (N, Cin, H, W) float32
      weight : (2*Cout, Cin, Kh, Kw) float32 — PyTorch Conv2d OIHW layout
               (first Cout output channels = feature conv, last Cout = gate)
      bias   : (2*Cout,) float32
      padding: symmetric spatial zero padding (stride=1)
      l_tile_target: target lanes per grid step (rounded to the halo block)
      mxu_dtype: dtype of the MXU operands (jnp.float32, or jnp.bfloat16 for
                 bandwidth-limited v5e); accumulation/epilogue stay f32.
    Returns:
      (N, Cout, Ho, Wo) float32
    """
    n, cin, h, w = x_nchw.shape
    co2, cin_w, kh, kw = weight.shape
    assert cin_w == cin and co2 % 2 == 0
    cout = co2 // 2

    hp, wp = h + 2 * padding, w + 2 * padding
    ho, wo = hp - kh + 1, wp - kw + 1
    assert ho >= 1 and wo >= 1

    itemsize = jnp.dtype(mxu_dtype).itemsize
    row_align = 8 * (4 // itemsize)          # sublane packing: 8 (f32) / 16 (bf16)
    cin_p = _round_up(cin, row_align)
    cout_p = _round_up(cout, 8)
    k_cat = kh * kw * cin_p

    # Flattened-spatial geometry: output column p = oh*Wp + ow reads input
    # columns p + i*Wp + j  (i < Kh, j < Kw).
    l_valid = (ho - 1) * wp + wo
    max_shift = (kh - 1) * wp + (kw - 1)
    halo_blk = _round_up(max(max_shift, 1), 128)       # 128-aligned halo block
    l_tile = min(_round_up(l_valid, halo_blk), _round_up(l_tile_target, halo_blk))
    num_t = pl.cdiv(l_valid, l_tile)
    l_total = num_t * l_tile                           # lane-dense output length
    lx = l_total + halo_blk                            # input length incl. halo
    ratio = l_tile // halo_blk                         # halo blocks per L tile

    # ---- layout glue (NCHW in, no data-tensor transposes) -------------------
    x_pad = jnp.pad(x_nchw, ((0, 0), (0, cin_p - cin),
                             (padding, padding), (padding, padding)))
    x_flat = x_pad.reshape(n, cin_p, hp * wp)
    x_flat = jnp.pad(x_flat, ((0, 0), (0, 0), (0, lx - hp * wp)))
    x_flat = x_flat.astype(mxu_dtype)

    # (2Cout, Cin, Kh, Kw) -> fused (2*Cout_p, Kh*Kw*Cin_p); column order must
    # match the xcat scratch: col = (i*Kw + j)*Cin_p + c.
    w_tap = jnp.transpose(weight, (0, 2, 3, 1))                      # (2Cout,Kh,Kw,Cin)
    w_tap = jnp.pad(w_tap, ((0, 0), (0, 0), (0, 0), (0, cin_p - cin)))
    w_tap = w_tap.reshape(co2, k_cat)
    w_cat = jnp.concatenate([
        jnp.pad(w_tap[:cout], ((0, cout_p - cout), (0, 0))),         # feature rows
        jnp.pad(w_tap[cout:], ((0, cout_p - cout), (0, 0))),         # gate rows
    ], axis=0).astype(mxu_dtype)                                     # (2*Cout_p, K)
    b_cat = jnp.concatenate([
        jnp.pad(bias[:cout], (0, cout_p - cout)),
        jnp.pad(bias[cout:], (0, cout_p - cout)),
    ]).reshape(2 * cout_p, 1).astype(jnp.float32)

    kernel = functools.partial(_gated_conv_kernel, kh=kh, kw=kw, wp=wp)

    # VMEM budget: double-buffered x/halo/out blocks + resident weights +
    # xcat scratch + f32 epilogue temporaries.  Capped under ~48 MiB (v7x-safe).
    est_vmem = (2 * cin_p * (l_tile + halo_blk) * itemsize
                + 2 * 2 * cout_p * k_cat * itemsize
                + k_cat * l_tile * itemsize
                + 2 * cout_p * l_tile * 4 * 2
                + 3 * 2 * cout_p * l_tile * 4)
    vmem_limit = int(min(max(2 * est_vmem, 32 << 20), 48 << 20))

    out_flat = pl.pallas_call(
        kernel,
        out_shape=jax.ShapeDtypeStruct((n, cout_p, l_total), jnp.float32),
        grid_spec=pltpu.PrefetchScalarGridSpec(
            num_scalar_prefetch=0,
            grid=(n, num_t),
            in_specs=[
                # current L tile of the flattened padded input
                pl.BlockSpec((1, cin_p, l_tile), lambda b, t: (b, 0, t)),
                # 128-aligned halo block immediately following the tile
                pl.BlockSpec((1, cin_p, halo_blk),
                             lambda b, t: (b, 0, (t + 1) * ratio)),
                # fused feat+gate weights / bias (resident across the grid)
                pl.BlockSpec((2 * cout_p, k_cat), lambda b, t: (0, 0)),
                pl.BlockSpec((2 * cout_p, 1), lambda b, t: (0, 0)),
            ],
            out_specs=pl.BlockSpec((1, cout_p, l_tile), lambda b, t: (b, 0, t)),
            scratch_shapes=[pltpu.VMEM((k_cat, l_tile), mxu_dtype)],
        ),
        compiler_params=pltpu.CompilerParams(
            dimension_semantics=("parallel", "parallel"),
            vmem_limit_bytes=vmem_limit),
    )(x_flat, x_flat, w_cat, b_cat)

    # Undo the flattened/padded layout: column p = oh*Wp + ow  ->  (Ho, Wo).
    out = out_flat[:, :cout, :l_valid]
    out = jnp.pad(out, ((0, 0), (0, 0), (0, ho * wp - l_valid)))
    out = out.reshape(n, cout, ho, wp)[:, :, :, :wo]
    return out


if __name__ == "__main__":
    key = jax.random.PRNGKey(0)
    k_x, k_w, k_b = jax.random.split(key, 3)

    # Module config: in_channels=4, out_channels=4, kernel_size=3, padding=1
    N, CIN, H, W = 2, 4, 16, 16
    COUT, KH, KW = 4, 3, 3

    x = jax.random.normal(k_x, (N, CIN, H, W), dtype=jnp.float32)
    # conv produces 2*out_channels channels (feature half + gate half)
    weight = jax.random.normal(k_w, (2 * COUT, CIN, KH, KW), jnp.float32) * 0.1
    bias = jax.random.normal(k_b, (2 * COUT,), jnp.float32) * 0.1

    y = simple_gated_conv_module(x, weight, bias, padding=1)
    y_bf16 = simple_gated_conv_module(x, weight, bias, padding=1,
                                      mxu_dtype=jnp.bfloat16)  # v5e-friendly path
    y, y_bf16 = jax.block_until_ready((y, y_bf16))

    # Pure-JAX reference: conv -> split -> ELU / sigmoid -> multiply.
    ref_conv = jax.lax.conv_general_dilated(
        x, weight, window_strides=(1, 1), padding=((1, 1), (1, 1)),
        dimension_numbers=("NCHW", "OIHW", "NCHW"),
        precision=jax.lax.Precision.HIGHEST) + bias.reshape(1, -1, 1, 1)
    ref = jax.nn.elu(ref_conv[:, :COUT]) * jax.nn.sigmoid(ref_conv[:, COUT:])

    assert y.shape == (N, COUT, H, W), y.shape
    err = float(jnp.max(jnp.abs(y - ref)))
    assert err < 2e-3, err                  # f32 MXU operands
    err_bf16 = float(jnp.max(jnp.abs(y_bf16 - ref)))
    assert err_bf16 < 5e-2, err_bf16        # bf16 MXU operands (looser tolerance)

    # Multi-tile path: larger image with a small L tile exercises the
    # L-tiling grid axis and the halo blocks.
    x2 = jax.random.normal(k_x, (1, CIN, 24, 24), dtype=jnp.float32)
    y2 = simple_gated_conv_module(x2, weight, bias, padding=1, l_tile_target=128)
    y2 = jax.block_until_ready(y2)
    ref2_conv = jax.lax.conv_general_dilated(
        x2, weight, window_strides=(1, 1), padding=((1, 1), (1, 1)),
        dimension_numbers=("NCHW", "OIHW", "NCHW"),
        precision=jax.lax.Precision.HIGHEST) + bias.reshape(1, -1, 1, 1)
    ref2 = jax.nn.elu(ref2_conv[:, :COUT]) * jax.nn.sigmoid(ref2_conv[:, COUT:])
    err2 = float(jnp.max(jnp.abs(y2 - ref2)))
    assert y2.shape == (1, COUT, 24, 24), y2.shape
    assert err2 < 2e-3, err2

    print("KERNEL_OK")
</pallas_src>

<mosaic_0001>
module attributes {stable_mosaic.version = 11 : i64} {
  func.func @_gated_conv_kernel(%arg0: i32, %arg1: i32, %arg2: memref<1x8x384xf32, #tpu.memory_space<vmem>>, %arg3: memref<1x8x128xf32, #tpu.memory_space<vmem>>, %arg4: memref<16x72xf32, #tpu.memory_space<vmem>>, %arg5: memref<16x1xf32, #tpu.memory_space<vmem>>, %arg6: memref<1x8x384xf32, #tpu.memory_space<vmem>>, %arg7: memref<72x384xf32, #tpu.memory_space<vmem>>) attributes {dimension_semantics = [#tpu.dimension_semantics<parallel>, #tpu.dimension_semantics<parallel>], iteration_bounds = array<i64: 2, 1>, scalar_prefetch = 0 : i64, scratch_operands = 1 : i64, tpu.core_type = #tpu.core_type<tc>, window_params = [{transform_indices = @transform_0, window_bounds = array<i64: 1, 8, 384>}, {transform_indices = @transform_1, window_bounds = array<i64: 1, 8, 128>}, {pipeline_mode = #tpu.pipeline_mode<synchronous>, transform_indices = @transform_2, window_bounds = array<i64: 16, 72>}, {pipeline_mode = #tpu.pipeline_mode<synchronous>, transform_indices = @transform_3, window_bounds = array<i64: 16, 1>}, {transform_indices = @transform_4, window_bounds = array<i64: 1, 8, 384>}]} {
    %c0 = arith.constant 0 : index
    %c0_0 = arith.constant 0 : index
    %c0_1 = arith.constant 0 : index
    %0 = vector.load %arg2[%c0, %c0_0, %c0_1] : memref<1x8x384xf32, #tpu.memory_space<vmem>>, vector<1x8x384xf32>
    %1 = vector.shape_cast %0 : vector<1x8x384xf32> to vector<8x384xf32>
    %c0_2 = arith.constant 0 : index
    %c0_3 = arith.constant 0 : index
    %2 = vector.load %arg7[%c0_2, %c0_3] : memref<72x384xf32, #tpu.memory_space<vmem>>, vector<8x384xf32>
    tpu.vector_store %arg7[%c0_2, %c0_3], %1 {strides = array<i32>} : memref<72x384xf32, #tpu.memory_space<vmem>>, vector<8x384xf32>,
    %c0_4 = arith.constant 0 : index
    %c0_5 = arith.constant 0 : index
    %c1 = arith.constant 1 : index
    %3 = vector.load %arg2[%c0_4, %c0_5, %c1] : memref<1x8x384xf32, #tpu.memory_space<vmem>>, vector<1x8x383xf32>
    %4 = vector.shape_cast %3 : vector<1x8x383xf32> to vector<8x383xf32>
    %c8 = arith.constant 8 : index
    %c0_6 = arith.constant 0 : index
    %5 = vector.load %arg7[%c8, %c0_6] : memref<72x384xf32, #tpu.memory_space<vmem>>, vector<8x383xf32>
    tpu.vector_store %arg7[%c8, %c0_6], %4 {strides = array<i32>} : memref<72x384xf32, #tpu.memory_space<vmem>>, vector<8x383xf32>,
    %c0_7 = arith.constant 0 : index
    %c0_8 = arith.constant 0 : index
    %c0_9 = arith.constant 0 : index
    %6 = vector.load %arg3[%c0_7, %c0_8, %c0_9] : memref<1x8x128xf32, #tpu.memory_space<vmem>>, vector<1x8x1xf32>
    %7 = vector.shape_cast %6 : vector<1x8x1xf32> to vector<8x1xf32>
    %c8_10 = arith.constant 8 : index
    %c383 = arith.constant 383 : index
    %8 = vector.load %arg7[%c8_10, %c383] : memref<72x384xf32, #tpu.memory_space<vmem>>, vector<8x1xf32>
    tpu.vector_store %arg7[%c8_10, %c383], %7 {strides = array<i32>} : memref<72x384xf32, #tpu.memory_space<vmem>>, vector<8x1xf32>,
    %c0_11 = arith.constant 0 : index
    %c0_12 = arith.constant 0 : index
    %c2 = arith.constant 2 : index
    %9 = vector.load %arg2[%c0_11, %c0_12, %c2] : memref<1x8x384xf32, #tpu.memory_space<vmem>>, vector<1x8x382xf32>
    %10 = vector.shape_cast %9 : vector<1x8x382xf32> to vector<8x382xf32>
    %c16 = arith.constant 16 : index
    %c0_13 = arith.constant 0 : index
    %11 = vector.load %arg7[%c16, %c0_13] : memref<72x384xf32, #tpu.memory_space<vmem>>, vector<8x382xf32>
    tpu.vector_store %arg7[%c16, %c0_13], %10 {strides = array<i32>} : memref<72x384xf32, #tpu.memory_space<vmem>>, vector<8x382xf32>,
    %c0_14 = arith.constant 0 : index
    %c0_15 = arith.constant 0 : index
    %c0_16 = arith.constant 0 : index
    %12 = vector.load %arg3[%c0_14, %c0_15, %c0_16] : memref<1x8x128xf32, #tpu.memory_space<vmem>>, vector<1x8x2xf32>
    %13 = vector.shape_cast %12 : vector<1x8x2xf32> to vector<8x2xf32>
    %c16_17 = arith.constant 16 : index
    %c382 = arith.constant 382 : index
    %14 = vector.load %arg7[%c16_17, %c382] : memref<72x384xf32, #tpu.memory_space<vmem>>, vector<8x2xf32>
    tpu.vector_store %arg7[%c16_17, %c382], %13 {strides = array<i32>} : memref<72x384xf32, #tpu.memory_space<vmem>>, vector<8x2xf32>,
    %c0_18 = arith.constant 0 : index
    %c0_19 = arith.constant 0 : index
    %c18 = arith.constant 18 : index
    %15 = vector.load %arg2[%c0_18, %c0_19, %c18] : memref<1x8x384xf32, #tpu.memory_space<vmem>>, vector<1x8x366xf32>
    %16 = vector.shape_cast %15 : vector<1x8x366xf32> to vector<8x366xf32>
    %c24 = arith.constant 24 : index
    %c0_20 = arith.constant 0 : index
    %17 = vector.load %arg7[%c24, %c0_20] : memref<72x384xf32, #tpu.memory_space<vmem>>, vector<8x366xf32>
    tpu.vector_store %arg7[%c24, %c0_20], %16 {strides = array<i32>} : memref<72x384xf32, #tpu.memory_space<vmem>>, vector<8x366xf32>,
    %c0_21 = arith.constant 0 : index
    %c0_22 = arith.constant 0 : index
    %c0_23 = arith.constant 0 : index
    %18 = vector.load %arg3[%c0_21, %c0_22, %c0_23] : memref<1x8x128xf32, #tpu.memory_space<vmem>>, vector<1x8x18xf32>
    %19 = vector.shape_cast %18 : vector<1x8x18xf32> to vector<8x18xf32>
    %c24_24 = arith.constant 24 : index
    %c366 = arith.constant 366 : index
    %20 = vector.load %arg7[%c24_24, %c366] : memref<72x384xf32, #tpu.memory_space<vmem>>, vector<8x18xf32>
    tpu.vector_store %arg7[%c24_24, %c366], %19 {strides = array<i32>} : memref<72x384xf32, #tpu.memory_space<vmem>>, vector<8x18xf32>,
    %c0_25 = arith.constant 0 : index
    %c0_26 = arith.constant 0 : index
    %c19 = arith.constant 19 : index
    %21 = vector.load %arg2[%c0_25, %c0_26, %c19] : memref<1x8x384xf32, #tpu.memory_space<vmem>>, vector<1x8x365xf32>
    %22 = vector.shape_cast %21 : vector<1x8x365xf32> to vector<8x365xf32>
    %c32 = arith.constant 32 : index
    %c0_27 = arith.constant 0 : index
    %23 = vector.load %arg7[%c32, %c0_27] : memref<72x384xf32, #tpu.memory_space<vmem>>, vector<8x365xf32>
    tpu.vector_store %arg7[%c32, %c0_27], %22 {strides = array<i32>} : memref<72x384xf32, #tpu.memory_space<vmem>>, vector<8x365xf32>,
    %c0_28 = arith.constant 0 : index
    %c0_29 = arith.constant 0 : index
    %c0_30 = arith.constant 0 : index
    %24 = vector.load %arg3[%c0_28, %c0_29, %c0_30] : memref<1x8x128xf32, #tpu.memory_space<vmem>>, vector<1x8x19xf32>
    %25 = vector.shape_cast %24 : vector<1x8x19xf32> to vector<8x19xf32>
    %c32_31 = arith.constant 32 : index
    %c365 = arith.constant 365 : index
    %26 = vector.load %arg7[%c32_31, %c365] : memref<72x384xf32, #tpu.memory_space<vmem>>, vector<8x19xf32>
    tpu.vector_store %arg7[%c32_31, %c365], %25 {strides = array<i32>} : memref<72x384xf32, #tpu.memory_space<vmem>>, vector<8x19xf32>,
    %c0_32 = arith.constant 0 : index
    %c0_33 = arith.constant 0 : index
    %c20 = arith.constant 20 : index
    %27 = vector.load %arg2[%c0_32, %c0_33, %c20] : memref<1x8x384xf32, #tpu.memory_space<vmem>>, vector<1x8x364xf32>
    %28 = vector.shape_cast %27 : vector<1x8x364xf32> to vector<8x364xf32>
    %c40 = arith.constant 40 : index
    %c0_34 = arith.constant 0 : index
    %29 = vector.load %arg7[%c40, %c0_34] : memref<72x384xf32, #tpu.memory_space<vmem>>, vector<8x364xf32>
    tpu.vector_store %arg7[%c40, %c0_34], %28 {strides = array<i32>} : memref<72x384xf32, #tpu.memory_space<vmem>>, vector<8x364xf32>,
    %c0_35 = arith.constant 0 : index
    %c0_36 = arith.constant 0 : index
    %c0_37 = arith.constant 0 : index
    %30 = vector.load %arg3[%c0_35, %c0_36, %c0_37] : memref<1x8x128xf32, #tpu.memory_space<vmem>>, vector<1x8x20xf32>
    %31 = vector.shape_cast %30 : vector<1x8x20xf32> to vector<8x20xf32>
    %c40_38 = arith.constant 40 : index
    %c364 = arith.constant 364 : index
    %32 = vector.load %arg7[%c40_38, %c364] : memref<72x384xf32, #tpu.memory_space<vmem>>, vector<8x20xf32>
    tpu.vector_store %arg7[%c40_38, %c364], %31 {strides = array<i32>} : memref<72x384xf32, #tpu.memory_space<vmem>>, vector<8x20xf32>,
    %c0_39 = arith.constant 0 : index
    %c0_40 = arith.constant 0 : index
    %c36 = arith.constant 36 : index
    %33 = vector.load %arg2[%c0_39, %c0_40, %c36] : memref<1x8x384xf32, #tpu.memory_space<vmem>>, vector<1x8x348xf32>
    %34 = vector.shape_cast %33 : vector<1x8x348xf32> to vector<8x348xf32>
    %c48 = arith.constant 48 : index
    %c0_41 = arith.constant 0 : index
    %35 = vector.load %arg7[%c48, %c0_41] : memref<72x384xf32, #tpu.memory_space<vmem>>, vector<8x348xf32>
    tpu.vector_store %arg7[%c48, %c0_41], %34 {strides = array<i32>} : memref<72x384xf32, #tpu.memory_space<vmem>>, vector<8x348xf32>,
    %c0_42 = arith.constant 0 : index
    %c0_43 = arith.constant 0 : index
    %c0_44 = arith.constant 0 : index
    %36 = vector.load %arg3[%c0_42, %c0_43, %c0_44] : memref<1x8x128xf32, #tpu.memory_space<vmem>>, vector<1x8x36xf32>
    %37 = vector.shape_cast %36 : vector<1x8x36xf32> to vector<8x36xf32>
    %c48_45 = arith.constant 48 : index
    %c348 = arith.constant 348 : index
    %38 = vector.load %arg7[%c48_45, %c348] : memref<72x384xf32, #tpu.memory_space<vmem>>, vector<8x36xf32>
    tpu.vector_store %arg7[%c48_45, %c348], %37 {strides = array<i32>} : memref<72x384xf32, #tpu.memory_space<vmem>>, vector<8x36xf32>,
    %c0_46 = arith.constant 0 : index
    %c0_47 = arith.constant 0 : index
    %c37 = arith.constant 37 : index
    %39 = vector.load %arg2[%c0_46, %c0_47, %c37] : memref<1x8x384xf32, #tpu.memory_space<vmem>>, vector<1x8x347xf32>
    %40 = vector.shape_cast %39 : vector<1x8x347xf32> to vector<8x347xf32>
    %c56 = arith.constant 56 : index
    %c0_48 = arith.constant 0 : index
    %41 = vector.load %arg7[%c56, %c0_48] : memref<72x384xf32, #tpu.memory_space<vmem>>, vector<8x347xf32>
    tpu.vector_store %arg7[%c56, %c0_48], %40 {strides = array<i32>} : memref<72x384xf32, #tpu.memory_space<vmem>>, vector<8x347xf32>,
    %c0_49 = arith.constant 0 : index
    %c0_50 = arith.constant 0 : index
    %c0_51 = arith.constant 0 : index
    %42 = vector.load %arg3[%c0_49, %c0_50, %c0_51] : memref<1x8x128xf32, #tpu.memory_space<vmem>>, vector<1x8x37xf32>
    %43 = vector.shape_cast %42 : vector<1x8x37xf32> to vector<8x37xf32>
    %c56_52 = arith.constant 56 : index
    %c347 = arith.constant 347 : index
    %44 = vector.load %arg7[%c56_52, %c347] : memref<72x384xf32, #tpu.memory_space<vmem>>, vector<8x37xf32>
    tpu.vector_store %arg7[%c56_52, %c347], %43 {strides = array<i32>} : memref<72x384xf32, #tpu.memory_space<vmem>>, vector<8x37xf32>,
    %c0_53 = arith.constant 0 : index
    %c0_54 = arith.constant 0 : index
    %c38 = arith.constant 38 : index
    %45 = vector.load %arg2[%c0_53, %c0_54, %c38] : memref<1x8x384xf32, #tpu.memory_space<vmem>>, vector<1x8x346xf32>
    %46 = vector.shape_cast %45 : vector<1x8x346xf32> to vector<8x346xf32>
    %c64 = arith.constant 64 : index
    %c0_55 = arith.constant 0 : index
    %47 = vector.load %arg7[%c64, %c0_55] : memref<72x384xf32, #tpu.memory_space<vmem>>, vector<8x346xf32>
    tpu.vector_store %arg7[%c64, %c0_55], %46 {strides = array<i32>} : memref<72x384xf32, #tpu.memory_space<vmem>>, vector<8x346xf32>,
    %c0_56 = arith.constant 0 : index
    %c0_57 = arith.constant 0 : index
    %c0_58 = arith.constant 0 : index
    %48 = vector.load %arg3[%c0_56, %c0_57, %c0_58] : memref<1x8x128xf32, #tpu.memory_space<vmem>>, vector<1x8x38xf32>
    %49 = vector.shape_cast %48 : vector<1x8x38xf32> to vector<8x38xf32>
    %c64_59 = arith.constant 64 : index
    %c346 = arith.constant 346 : index
    %50 = vector.load %arg7[%c64_59, %c346] : memref<72x384xf32, #tpu.memory_space<vmem>>, vector<8x38xf32>
    tpu.vector_store %arg7[%c64_59, %c346], %49 {strides = array<i32>} : memref<72x384xf32, #tpu.memory_space<vmem>>, vector<8x38xf32>,
    %c0_60 = arith.constant 0 : index
    %c0_61 = arith.constant 0 : index
    %51 = vector.load %arg4[%c0_60, %c0_61] : memref<16x72xf32, #tpu.memory_space<vmem>>, vector<16x72xf32>
    %c0_62 = arith.constant 0 : index
    %c0_63 = arith.constant 0 : index
    %52 = vector.load %arg7[%c0_62, %c0_63] : memref<72x384xf32, #tpu.memory_space<vmem>>, vector<72x384xf32>
    %cst = arith.constant dense<0.000000e+00> : vector<16x384xf32>
    %53 = tpu.matmul %51, %52, %cst {dimension_numbers = #tpu.dot_dimension_numbers<[1], [0], [0], [1], [0, 0, 1, 1], [], []>} : vector<16x72xf32>, vector<72x384xf32>, vector<16x384xf32> -> vector<16x384xf32>
    %c0_64 = arith.constant 0 : index
    %c0_65 = arith.constant 0 : index
    %54 = vector.load %arg5[%c0_64, %c0_65] : memref<16x1xf32, #tpu.memory_space<vmem>>, vector<16x1xf32>
    %55 = vector.broadcast %54 : vector<16x1xf32> to vector<16x384xf32>
    %56 = arith.addf %53, %55 : vector<16x384xf32>
    %57 = vector.extract_strided_slice %56 {offsets = [0, 0], sizes = [8, 384], strides = [1, 1]} : vector<16x384xf32> to vector<8x384xf32>
    %58 = vector.extract_strided_slice %56 {offsets = [8, 0], sizes = [8, 384], strides = [1, 1]} : vector<16x384xf32> to vector<8x384xf32>
    %cst_66 = arith.constant 0.000000e+00 : f32
    %59 = vector.broadcast %cst_66 : f32 to vector<8x384xf32>
    %60 = arith.cmpf ogt, %57, %59 : vector<8x384xf32>
    %cst_67 = arith.constant 0.000000e+00 : f32
    %61 = vector.broadcast %cst_67 : f32 to vector<8x384xf32>
    %62 = arith.minimumf %57, %61 : vector<8x384xf32>
    %63 = math.exp %62 : vector<8x384xf32>
    %cst_68 = arith.constant 1.000000e+00 : f32
    %64 = vector.broadcast %cst_68 : f32 to vector<8x384xf32>
    %65 = arith.subf %63, %64 : vector<8x384xf32>
    %66 = arith.select %60, %57, %65 : vector<8x384xi1>, vector<8x384xf32>
    %cst_69 = arith.constant 5.000000e-01 : f32
    %67 = vector.broadcast %cst_69 : f32 to vector<8x384xf32>
    %68 = arith.mulf %67, %58 : vector<8x384xf32>
    %69 = math.tanh %68 : vector<8x384xf32>
    %cst_70 = arith.constant 5.000000e-01 : f32
    %70 = vector.broadcast %cst_70 : f32 to vector<8x384xf32>
    %71 = arith.mulf %70, %69 : vector<8x384xf32>
    %cst_71 = arith.constant 5.000000e-01 : f32
    %72 = vector.broadcast %cst_71 : f32 to vector<8x384xf32>
    %73 = arith.addf %71, %72 : vector<8x384xf32>
    %74 = arith.mulf %66, %73 : vector<8x384xf32>
    %c0_72 = arith.constant 0 : index
    %c0_73 = arith.constant 0 : index
    %c0_74 = arith.constant 0 : index
    %75 = vector.load %arg6[%c0_72, %c0_73, %c0_74] : memref<1x8x384xf32, #tpu.memory_space<vmem>>, vector<1x8x384xf32>
    %76 = vector.shape_cast %75 : vector<1x8x384xf32> to vector<8x384xf32>
    %77 = vector.shape_cast %74 : vector<8x384xf32> to vector<1x8x384xf32>
    tpu.vector_store %arg6[%c0_72, %c0_73, %c0_74], %77 {strides = array<i32>} : memref<1x8x384xf32, #tpu.memory_space<vmem>>, vector<1x8x384xf32>,
    return
  }
  func.func @transform_0(%arg0: i32, %arg1: i32) -> (i32, i32, i32) {
    %c0_i32 = arith.constant 0 : i32
    %c0_i32_0 = arith.constant 0 : i32
    return %arg0, %c0_i32, %arg1 : i32, i32, i32
  }
  func.func @transform_1(%arg0: i32, %arg1: i32) -> (i32, i32, i32) {
    %c1_i32 = arith.constant 1 : i32
    %0 = arith.addi %arg1, %c1_i32 : i32
    %c3_i32 = arith.constant 3 : i32
    %1 = arith.muli %0, %c3_i32 : i32
    %c0_i32 = arith.constant 0 : i32
    %c0_i32_0 = arith.constant 0 : i32
    return %arg0, %c0_i32, %1 : i32, i32, i32
  }
  func.func @transform_2(%arg0: i32, %arg1: i32) -> (i32, i32) {
    %c0_i32 = arith.constant 0 : i32
    %c0_i32_0 = arith.constant 0 : i32
    %c0_i32_1 = arith.constant 0 : i32
    return %c0_i32, %c0_i32_0 : i32, i32
  }
  func.func @transform_3(%arg0: i32, %arg1: i32) -> (i32, i32) {
    %c0_i32 = arith.constant 0 : i32
    %c0_i32_0 = arith.constant 0 : i32
    %c0_i32_1 = arith.constant 0 : i32
    return %c0_i32, %c0_i32_0 : i32, i32
  }
  func.func @transform_4(%arg0: i32, %arg1: i32) -> (i32, i32, i32) {
    %c0_i32 = arith.constant 0 : i32
    %c0_i32_0 = arith.constant 0 : i32
    return %arg0, %c0_i32, %arg1 : i32, i32, i32
  }
}

</mosaic_0001>

<bundles_post_ra>
// kernel: tpu_custom_call.1
= control target key start
LH: loop header
LB: loop body
LE: loop exit
PB: predicated region body
PF: predicated region fallthrough
CT: control target
= control target key end

     0   :  { %s1438_s0 = inlined_call_operand.hbm [shape: f32[2,8,512], index: 0, kind: input, shape index: {}]   ;;  %s1439_s1 = inlined_call_operand.hbm [shape: f32[2,8,512], index: 1, kind: input, shape index: {}]   ;;  %s1440_s2 = inlined_call_operand.vmem [shape: f32[16,72], index: 2, kind: input, shape index: {}]   ;;  %s1441_s3 = inlined_call_operand.vmem [shape: f32[16,1], index: 3, kind: input, shape index: {}]   ;;  %s1442_s4 = inlined_call_operand.hbm [shape: f32[2,8,384], index: 4, kind: output, shape index: {}]  }
   0x1   :  { %1443 = sst [smem:[#allocation12_spill]] %s1438_s0 }
   0x2   :  { %9 = vsyncpa [#allocation4], 0 }
   0x3   :  { %11 = vsyncpa [#allocation4 + $0x1], 0 }
   0x4   :  { %12 = vsyncpa [#allocation7], 0 }
   0x5   :  { %14 = vsyncpa [#allocation7 + $0x1], 0 }
   0x6   :  { %15 = vsyncpa [#allocation5], 0 }
   0x7   :  { %17 = vsyncpa [#allocation5 + $0x1], 0  ;;  %s1217_s15 = smov 0   ;;  %s1219_s16 = smov 0  }
   0x8   :  { %s1221_s17 = smov 0   ;;  %s1223_s18 = smov 0  }
   0x9   :  { %s1225_s19 = smov 0   ;;  %s1227_s20 = smov 0  }
   0xa LB: > { %s887_s21 = sadd.s32 4294967295, %s1177_s20   ;;  %s888_s22 = sadd.s32 4294967294, %s1177_s20   ;;  %s1177_s20 = sphi %s1227_s20, %s23_s20   ;;  %s1173_s19 = sphi %s1225_s19, %s1456_s19   ;;  %s1169_s18 = sphi %s1223_s18, %s1455_s18   ;;  %s1165_s17 = sphi %s1221_s17, %s1454_s17   ;;  %s1161_s16 = sphi %s1219_s16, %s1453_s16   ;;  %s1157_s15 = sphi %s1217_s15, %s1452_s15  }
   0xb   : > { %s35_s23 = sadd.s32 1, %s1173_s19  ;;  %s44_s24 = sadd.s32 1, %s1165_s17 }
   0xc   : > { %p37_p0 = scmp.ge.s32.totalorder %s35_s23, 2  ;;  %p51_p1 = scmp.ne.s32.totalorder %s1165_s17, %s1161_s16 }
   0xd   : > { %p52_p2 = scmp.eq.s32.totalorder %s1177_s20, 0  ;;  %p57_p3 = scmp.ne.s32.totalorder %s1161_s16, %s1157_s15 }
   0xe   : > { %s1458_s23 = smov (%p37_p0, %s35_s23), 0  ;;  %p58_p5 = scmp.eq.s32.totalorder %s887_s21, 0 }
   0xf   : > { %p1258_p4 = por %p52_p2, %p51_p1  ;;  %s39_s26 = ssub.s32 %s1173_s19, %s1458_s23 }
  0x10   : > { %p157_p6 = scmp.eq.s32.totalorder %s887_s21, 1  ;;  %p42_p7 = scmp.eq.s32.totalorder %s39_s26, 0 }
  0x11   : > { %p1264_p8 = por %p58_p5, %p57_p3  ;;  %p163_p10 = scmp.eq.s32.totalorder %s888_s22, 1 }
  0x12   : > { %p1268_p9 = por %p157_p6, %p51_p1  ;;  %p962_p13 = scmp.lt.s32.totalorder %s1177_s20, 2 }
  0x13   : > { %s1273_s29 = scalar_select %p42_p7, %s1165_s17, %s44_s24  }
  0x14   : > { %p1275_p11 = por %p163_p10, %p57_p3  ;;  %s1282_s5 = sand.u32 1, %s1165_s17  }
  0x15   : > { %s942_s6 = smul.u32 24, %s1282_s5  ;;  %s908_s7 = sshll.u32 %s1173_s19, 9 }
  0x16   : > { %p1288_p0 = pnand %p962_p13, %p1258_p4  ;;  %s1449_s0 = sld [smem:[#allocation12_spill]] }
  0x17   : > { %s193_s12 = scalar_lea.vmem [#allocation3], %s942_s6  ;;  %p896_p1 = scmp.ge.s32.totalorder %s1177_s20, 1 }
  0x18   : > { %s209_s13 = sshll.u32 %s193_s12, 4  ;;  %s190_s14 = scalar_lea.sflag [#allocation4], %s1282_s5  ;;  %s210_s13 = int_to_ptr.vmem [resolvable:$true] %s209_s13 }
  0x19   : > { %p1038_p2 = pneg %p1288_p0  ;;  %s1049_s21 = scalar_lea.vmem %s210_s13, 384 }
  0x1a   : > { %p1050_p3 = scmp.ne.s32.totalorder %s210_s13, %s1049_s21  ;;  %s1179_s22 = smov [#allocation3]  }
  0x1b   : > { %s1054_s24 = sshll.u32 %s1179_s22, 4  ;;  %s1055_s24 = int_to_ptr.vmem [resolvable:$false] %s1054_s24 }
  0x1c   : > { %s206_s11 = scalar_lea.hbm %s1449_s0, %s908_s7  ;;  %p1052_p4 = pnand %p1050_p3, %p1038_p2 }
  0x1d   : > { %s1056_s25 = scalar_lea.vmem %s1055_s24, 768  ;;  %p1057_p6 = scmp.lt.s32.totalorder %s210_s13, %s1055_s24 }
  0x1e   : > { %p1053_p5 = pneg %p1052_p4  ;;  %p1058_p7 = scmp.lt.s32.totalorder %s1056_s25, %s1049_s21 }
  0x20   : > { %p1059_p10 = por %p1058_p7, %p1057_p6 }
  0x22   : > { %p1060_p13 = pnand %p1059_p10, %p1053_p5 }
  0x24   : > { %1063 = shalt.err (!%p1060_p13)
}
  0x25   : > { %954 = dma.hbm_to_vmem [thread:$0]  (!%p1288_p0), %s206_s11, 384, %s210_s13, %s190_s14  }
  0x26   : > { %p236_p12 = scmp.lt.s32.totalorder %s1177_s20, 3  ;;  %s893_s26 = sshll.u32 %s1282_s5, 3 }
  0x27   : > { %s818_s10 = scalar_lea.hbm %s1439_s1, %s908_s7  ;;  %s220_s22 = scalar_lea.vmem [#allocation6], %s893_s26 }
  0x28   : > { %p1311_p3 = pnand %p896_p1, %p236_p12  ;;  %s819_s21 = scalar_lea.hbm %s818_s10, 384 }
  0x29   : > { %s231_s24 = sshll.u32 %s220_s22, 4  ;;  %s217_s25 = scalar_lea.sflag [#allocation7], %s1282_s5  ;;  %s232_s24 = int_to_ptr.vmem [resolvable:$true] %s231_s24 }
  0x2a   : > { %s1077_s0 = scalar_lea.vmem %s232_s24, 128  ;;  %s1180_s11 = smov [#allocation6]  }
  0x2b   : > { %p1078_p4 = scmp.ne.s32.totalorder %s232_s24, %s1077_s0  ;;  %s1082_s13 = sshll.u32 %s1180_s11, 4  ;;  %s1083_s13 = int_to_ptr.vmem [resolvable:$false] %s1082_s13 }
  0x2c   : > { %s1084_s7 = scalar_lea.vmem %s1083_s13, 256  ;;  %p1085_p7 = scmp.lt.s32.totalorder %s232_s24, %s1083_s13 }
  0x2d   : > { %p1080_p5 = pnand %p1078_p4, %p1038_p2  ;;  %p1086_p12 = scmp.lt.s32.totalorder %s1084_s7, %s1077_s0 }
  0x2f   : > { %p1081_p6 = pneg %p1080_p5  ;;  %p1087_p1 = por %p1086_p12, %p1085_p7 }
  0x31   : > { %p1088_p10 = pnand %p1087_p1, %p1081_p6 }
  0x33   : > { %1091 = shalt.err (!%p1088_p10)
}
  0x34   : > { %957 = dma.hbm_to_vmem [thread:$0]  (!%p1288_p0), %s819_s21, 128, %s232_s24, %s217_s25  }
  0x35   : > { %240 = sbr.rel (%p1311_p3) target bundleno = 485 (0x1e5), region = 36  ;;  %s1324_s5 = sand.u32 (!%p1311_p3), 1, %s1161_s16  }
  0x36   : > { %s943_s14 = smul.u32 (!%p1311_p3), 24, %s1324_s5  ;;  %s243_s26 = scalar_lea.sflag (!%p1311_p3), [#allocation4], %s1324_s5 }
  0x38   : > { %s246_s0 = scalar_lea.vmem (!%p1311_p3), [#allocation3], %s943_s14 }
  0x3a   : > { %1144 = dma.done.wait (%p1264_p8), %s243_s26, 384  }
  0x3b   : > { %1146 = vsyncadd (%p1264_p8), %s243_s26, 4294966912  ;;  %s897_s8 = sshll.u32 %s1324_s5, 3  ;;  %s252_s6 = scalar_lea.sflag [#allocation7], %s1324_s5 }
  0x3c   : > { %s255_s9 = scalar_lea.vmem [#allocation6], %s897_s8 }
  0x3d   : > { %1148 = dma.done.wait (%p1264_p8), %s252_s6, 128  }
  0x3e   : > { %1150 = vsyncadd (%p1264_p8), %s252_s6, 4294967168  ;;  %v1340_v0 = vld [vmem:[%s246_s0 + $0x8] sm:$0xff]  ;;  %v1342_v1 = vld [vmem:[%s246_s0] sm:$0xff]  ;;  %s1181_s10 = smov 90   ;;  %s1182_s12 = smov 91   ;;  %v1188_v4 = vmov 0.0  }
  0x3f   : > { %v1344_v2 = vld [vmem:[%s246_s0 + $0x10] sm:$0xff]  ;;  %503 = vrot.lane.b32.xlu0 %v1340_v0, %s1181_s10  ;;  %501 = vrot.lane.b32.xlu1 %v1342_v1, %s1181_s10  ;;  %s1183_s27 = smov 92   ;;  %s1184_s21 = smov 108   ;;  %vm564_vm0 = vcmask 588800   ;;  %v1190_v8 = vmov 0   ;;  %vm507_vm1 = vcmask 736256  }
  0x40   : > { %v516_v3 = vld [vmem:[%s255_s9] sm:$0xff]  ;;  %s1185_s22 = smov 109   ;;  %s1186_s24 = smov 110   ;;  %635 = vmatprep.mubr.f32.mxu0 %v1188_v4  ;;  %v1370_v5 = vld [vmem:[%s1440_s2] sm:$0xff]  ;;  %1022 = vset.pattern.permute.xlu0 %v1190_v8  ;;  %vm479_vm2 = vcmask 744448   ;;  %vm451_vm3 = vcmask 752640  }
  0x41   : > { %s1187_s25 = smov 126   ;;  %939 = vmatprep.mubr.msk.f32.mxu1 %vm564_vm0, %v1370_v5  ;;  %s1189_s7 = smov 127   ;;  %v552_v6 = vld [vmem:[%s1441_s3] sm:$0xff]  ;;  %v553_v7 = vld [vmem:[%s1441_s3 + $0x8] sm:$0xff]  ;;  %1023 = vset.pattern.permute.xlu1 %v1190_v8  ;;  %vm521_vm4 = vcmask 1048272   ;;  %vm423_vm5 = vcmask 883712  }
  0x42   : > { %vm493_vm6 = vcmask 1048280   ;;  %vm395_vm7 = vcmask 891904   ;;  %vm465_vm8 = vcmask 1048288   ;;  %vm367_vm9 = vcmask 900096   ;;  %v524_v62 = vld [vmem:[%s1440_s2 + $0x8] sm:$0xff]  ;;  %s1191_s13 = smov [#allocation8]  }
  0x43   : > { %505 = vrot.lane.b32.xlu0 %v1344_v2, %s1181_s10  ;;  %475 = vrot.lane.b32.xlu1 %v1340_v0, %s1182_s12  ;;  %vm437_vm10 = vcmask 1048416   ;;  %vm339_vm11 = vcmask 1031168   ;;  %vm409_vm12 = vcmask 1048424   ;;  %vm311_vm13 = vcmask 1039360  }
  0x44   : > { %vm381_vm14 = vcmask 1048432   ;;  %vm353_vm15 = vcmask 1048560  }
  0x47   : > { %477 = vrot.lane.b32.xlu0 %v1344_v2, %s1182_s12  ;;  %473 = vrot.lane.b32.xlu1 %v1342_v1, %s1182_s12 }
  0x4b   : > { %449 = vrot.lane.b32.xlu1 %v1344_v2, %s1183_s27  ;;  %447 = vrot.lane.b32.xlu0 %v1340_v0, %s1183_s27 }
  0x4f   : > { %518 = vrot.lane.b32.xlu0 %v516_v3, %s1181_s10  ;;  %445 = vrot.lane.b32.xlu1 %v1342_v1, %s1183_s27 }
  0x53   : > { %421 = vrot.lane.b32.xlu1 %v1344_v2, %s1184_s21  ;;  %419 = vrot.lane.b32.xlu0 %v1340_v0, %s1184_s21 }
  0x57   : > { %490 = vrot.lane.b32.xlu0 %v516_v3, %s1182_s12  ;;  %417 = vrot.lane.b32.xlu1 %v1342_v1, %s1184_s21  ;;  %s284_s12 = scalar_lea.vmem [#allocation8], %s943_s14  ;;  %s760_s14 = scalar_lea.sflag [#allocation5], %s1324_s5 }
  0x5b   : > { %393 = vrot.lane.b32.xlu1 %v1344_v2, %s1185_s22  ;;  %391 = vrot.lane.b32.xlu0 %v1340_v0, %s1185_s22 }
  0x5f   : > { %462 = vrot.lane.b32.xlu0 %v516_v3, %s1183_s27  ;;  %389 = vrot.lane.b32.xlu1 %v1342_v1, %s1185_s22  ;;  %s944_s27 = smul.u32 384, %s1169_s18  ;;  %s1097_s18 = sshll.u32 %s1191_s13, 4  ;;  %s1098_s18 = int_to_ptr.vmem [resolvable:$false] %s1097_s18 }
  0x63   : > { %365 = vrot.lane.b32.xlu1 %v1344_v2, %s1186_s24  ;;  %363 = vrot.lane.b32.xlu0 %v1340_v0, %s1186_s24 }
  0x67   : > { %434 = vrot.lane.b32.xlu0 %v516_v3, %s1184_s21  ;;  %361 = vrot.lane.b32.xlu1 %v1342_v1, %s1186_s24  ;;  %s776_s21 = sshll.u32 %s284_s12, 4  ;;  %s777_s21 = int_to_ptr.vmem [resolvable:$true] %s776_s21 }
  0x68   : > { %s1093_s11 = scalar_lea.vmem %s777_s21, 384  ;;  %p1100_p13 = scmp.lt.s32.totalorder %s777_s21, %s1098_s18 }
  0x69   : > { %p1094_p8 = scmp.ne.s32.totalorder %s777_s21, %s1093_s11 }
  0x6b   : > { %337 = vrot.lane.b32.xlu1 %v1344_v2, %s1187_s25  ;;  %335 = vrot.lane.b32.xlu0 %v1340_v0, %s1187_s25  ;;  %p1095_p0 = pnand %p1094_p8, %p1268_p9 }
  0x6d   : > { %p1096_p2 = pneg %p1095_p0 }
  0x6f   : > { %406 = vrot.lane.b32.xlu0 %v516_v3, %s1185_s22  ;;  %333 = vrot.lane.b32.xlu1 %v1342_v1, %s1187_s25 }
  0x73   : > { %309 = vrot.lane.b32.xlu1 %v1344_v2, %s1189_s7  ;;  %307 = vrot.lane.b32.xlu0 %v1340_v0, %s1189_s7 }
  0x77   : > { %378 = vrot.lane.b32.xlu0 %v516_v3, %s1186_s24  ;;  %305 = vrot.lane.b32.xlu1 %v1342_v1, %s1189_s7 }
  0x7b   : > { %350 = vrot.lane.b32.xlu0 %v516_v3, %s1187_s25  ;;  %322 = vrot.lane.b32.xlu1 %v516_v3, %s1189_s7  ;;  %s774_s25 = scalar_lea.hbm %s1442_s4, %s944_s27  ;;  %s1099_s7 = scalar_lea.vmem %s1098_s18, 768 }
  0x7c   : > { %p1101_p3 = scmp.lt.s32.totalorder %s1099_s7, %s1093_s11 }
  0x7e   : > { %p1102_p4 = por %p1101_p3, %p1100_p13 }
  0x7f   : > { %556 = vperm.xlu0 %1022, %v552_v6   ;;  %561 = vperm.xlu1 %1023, %v553_v7  }
  0x80   : > { %p1103_p5 = pnand %p1102_p4, %p1096_p2 }
  0xb1   : > { %v504_v9 = vpop.permute.xlu0 %503  ;;  %v502_v10 = vpop.permute.xlu1 %501 }
  0xb2   : > { %v508_v11 = vsel %vm507_vm1, %v502_v10, %v504_v9 }
  0xb5   : > { %v506_v12 = vpop.permute.xlu0 %505  ;;  %v476_v13 = vpop.permute.xlu1 %475 }
  0xb6   : > { %v509_v14 = vsel %vm507_vm1, %v504_v9, %v506_v12  ;;  %515 = vst.msk [vmem:[#allocation2 + $0xd0] sm:$0xff] %vm507_vm1, %v506_v12  ;;  %vm325_vm1 = vcmask 1048568  }
  0xb7   : > { %585 = vmatprep.subr.mxu0 %v509_v14 }
  0xb8   : > { %586 = vmatpush1.msra.mxu0 %v508_v11 }
  0xb9   : > { %v478_v15 = vpop.permute.xlu0 %477  ;;  %v474_v16 = vpop.permute.xlu1 %473 }
  0xba   : > { %v481_v17 = vsel %vm479_vm2, %v476_v13, %v478_v15  ;;  %487 = vst.msk [vmem:[#allocation2 + $0xb8] sm:$0xff] %vm479_vm2, %v478_v15  ;;  %v480_v18 = vsel %vm479_vm2, %v474_v16, %v476_v13 }
  0xbb   : > { %587 = vmatprep.subr.mxu0 %v481_v17 }
  0xbc   : > { %588 = vmatpush1.msra.mxu0 %v480_v18 }
  0xbd   : > { %v450_v19 = vpop.permute.xlu1 %449  ;;  %v448_v20 = vpop.permute.xlu0 %447 }
  0xbe   : > { %459 = vst.msk [vmem:[#allocation2 + $0xa0] sm:$0xff] %vm451_vm3, %v450_v19  ;;  %v453_v21 = vsel %vm451_vm3, %v448_v20, %v450_v19 }
  0xbf   : > { %589 = vmatprep.subr.mxu0 %v453_v21 }
  0xc1   : > { %v519_v22 = vpop.permute.xlu0 %518  ;;  %v446_v23 = vpop.permute.xlu1 %445 }
  0xc2   : > { %522 = vst.msk [vmem:[#allocation2 + $0xd0] sm:$0xff] %vm521_vm4, %v519_v22  ;;  %v452_v24 = vsel %vm451_vm3, %v446_v23, %v448_v20 }
  0xc3   : > { %590 = vmatpush1.msra.mxu0 %v452_v24 }
  0xc5   : > { %v422_v25 = vpop.permute.xlu1 %421  ;;  %v420_v26 = vpop.permute.xlu0 %419 }
  0xc6   : > { %431 = vst.msk [vmem:[#allocation2 + $0x88] sm:$0xff] %vm423_vm5, %v422_v25  ;;  %v425_v27 = vsel %vm423_vm5, %v420_v26, %v422_v25 }
  0xc7   : > { %591 = vmatprep.subr.mxu0 %v425_v27 }
  0xc9   : > { %v491_v28 = vpop.permute.xlu0 %490  ;;  %v418_v29 = vpop.permute.xlu1 %417  ;;  %v551_v30 = vld [vmem:[#allocation2 + $0xd0] sm:$0xff] }
  0xca   : > { %494 = vst.msk [vmem:[#allocation2 + $0xb8] sm:$0xff] %vm493_vm6, %v491_v28  ;;  %v424_v31 = vsel %vm423_vm5, %v418_v29, %v420_v26  ;;  %921 = vmatprep.subr.mxu1 %v551_v30 }
  0xcb   : > { %922 = vmatpush3.msra.mxu1 %v551_v30  ;;  %592 = vmatpush1.msra.mxu0 %v424_v31 }
  0xcd   : > { %v394_v32 = vpop.permute.xlu1 %393  ;;  %v392_v33 = vpop.permute.xlu0 %391 }
  0xce   : > { %403 = vst.msk [vmem:[#allocation2 + $0x70] sm:$0xff] %vm395_vm7, %v394_v32  ;;  %v397_v34 = vsel %vm395_vm7, %v392_v33, %v394_v32 }
  0xcf   : > { %593 = vmatprep.subr.mxu0 %v397_v34 }
  0xd1   : > { %v463_v35 = vpop.permute.xlu0 %462  ;;  %v390_v36 = vpop.permute.xlu1 %389  ;;  %v548_v37 = vld [vmem:[#allocation2 + $0xb8] sm:$0xff] }
  0xd2   : > { %466 = vst.msk [vmem:[#allocation2 + $0xa0] sm:$0xff] %vm465_vm8, %v463_v35  ;;  %v396_v38 = vsel %vm395_vm7, %v390_v36, %v392_v33  ;;  %923 = vmatprep.subr.mxu1 %v548_v37 }
  0xd3   : > { %924 = vmatpush3.msra.mxu1 %v548_v37  ;;  %594 = vmatpush1.msra.mxu0 %v396_v38 }
  0xd5   : > { %v366_v39 = vpop.permute.xlu1 %365  ;;  %v364_v40 = vpop.permute.xlu0 %363 }
  0xd6   : > { %375 = vst.msk [vmem:[#allocation2 + $0x58] sm:$0xff] %vm367_vm9, %v366_v39  ;;  %v369_v41 = vsel %vm367_vm9, %v364_v40, %v366_v39 }
  0xd7   : > { %595 = vmatprep.subr.mxu0 %v369_v41 }
  0xd9   : > { %v435_v42 = vpop.permute.xlu0 %434  ;;  %v362_v43 = vpop.permute.xlu1 %361  ;;  %v545_v44 = vld [vmem:[#allocation2 + $0xa0] sm:$0xff] }
  0xda   : > { %438 = vst.msk [vmem:[#allocation2 + $0x88] sm:$0xff] %vm437_vm10, %v435_v42  ;;  %v368_v45 = vsel %vm367_vm9, %v362_v43, %v364_v40  ;;  %925 = vmatprep.subr.mxu1 %v545_v44 }
  0xdb   : > { %926 = vmatpush3.msra.mxu1 %v545_v44  ;;  %596 = vmatpush1.msra.mxu0 %v368_v45 }
  0xdd   : > { %v338_v46 = vpop.permute.xlu1 %337  ;;  %v336_v47 = vpop.permute.xlu0 %335 }
  0xde   : > { %347 = vst.msk [vmem:[#allocation2 + $0x40] sm:$0xff] %vm339_vm11, %v338_v46  ;;  %v341_v48 = vsel %vm339_vm11, %v336_v47, %v338_v46 }
  0xdf   : > { %597 = vmatprep.subr.mxu0 %v341_v48 }
  0xe1   : > { %v407_v49 = vpop.permute.xlu0 %406  ;;  %v334_v50 = vpop.permute.xlu1 %333  ;;  %v542_v51 = vld [vmem:[#allocation2 + $0x88] sm:$0xff] }
  0xe2   : > { %410 = vst.msk [vmem:[#allocation2 + $0x70] sm:$0xff] %vm409_vm12, %v407_v49  ;;  %v340_v52 = vsel %vm339_vm11, %v334_v50, %v336_v47  ;;  %927 = vmatprep.subr.mxu1 %v542_v51 }
  0xe3   : > { %928 = vmatpush3.msra.mxu1 %v542_v51  ;;  %598 = vmatpush1.msra.mxu0 %v340_v52 }
  0xe5   : > { %v310_v53 = vpop.permute.xlu1 %309  ;;  %v308_v54 = vpop.permute.xlu0 %307 }
  0xe6   : > { %319 = vst.msk [vmem:[#allocation2 + $0x28] sm:$0xff] %vm311_vm13, %v310_v53  ;;  %v313_v55 = vsel %vm311_vm13, %v308_v54, %v310_v53 }
  0xe7   : > { %599 = vmatprep.subr.mxu0 %v313_v55 }
  0xe9   : > { %v379_v56 = vpop.permute.xlu0 %378  ;;  %v306_v57 = vpop.permute.xlu1 %305  ;;  %v539_v58 = vld [vmem:[#allocation2 + $0x70] sm:$0xff] }
  0xea   : > { %382 = vst.msk [vmem:[#allocation2 + $0x58] sm:$0xff] %vm381_vm14, %v379_v56  ;;  %v312_v59 = vsel %vm311_vm13, %v306_v57, %v308_v54  ;;  %929 = vmatprep.subr.mxu1 %v539_v58 }
  0xeb   : > { %930 = vmatpush3.msra.mxu1 %v539_v58  ;;  %600 = vmatpush1.msra.mxu0 %v312_v59 }
  0xec   : > { %601 = vmatprep.subr.mxu0 %v1340_v0 }
  0xed   : > { %v351_v60 = vpop.permute.xlu0 %350  ;;  %v323_v61 = vpop.permute.xlu1 %322  ;;  %602 = vmatpush1.msra.mxu0 %v1342_v1 }
  0xee   : > { %354 = vst.msk [vmem:[#allocation2 + $0x40] sm:$0xff] %vm353_vm15, %v351_v60  ;;  %898 = vmatmul.mubr.msk.f32.vlgmr.msra.gmra.mxu0 %vm564_vm0, %v1370_v5 }
  0xef   : > { %326 = vst.msk [vmem:[#allocation2 + $0x28] sm:$0xff] %vm325_vm1, %v323_v61  ;;  %641 = vmatprep.mubr.f32.mxu0 %v1188_v4 }
  0xf1   : > { %v536_v63 = vld [vmem:[#allocation2 + $0x58] sm:$0xff] }
  0xf2   : > { %931 = vmatprep.subr.mxu1 %v536_v63  ;;  %899 = vmatmul.mubr.msk.f32.gmra.mxu0 %vm564_vm0, %v524_v62 }
  0xf3   : > { %932 = vmatpush3.msra.mxu1 %v536_v63 }
  0xf5   : > { %v533_v0 = vld [vmem:[#allocation2 + $0x40] sm:$0xff] }
  0xf6   : > { %v530_v3 = vld [vmem:[#allocation2 + $0x28] sm:$0xff]  ;;  %933 = vmatprep.subr.mxu1 %v533_v0 }
  0xf7   : > { %934 = vmatpush3.msra.mxu1 %v533_v0 }
  0xf8   : > { %935 = vmatprep.subr.mxu1 %v530_v3 }
  0xf9   : > { %936 = vmatpush3.msra.mxu1 %v530_v3 }
  0xfa   : > { %937 = vmatprep.subr.mxu1 %v1344_v2  ;;  %v557_v1 = vpop.permute.xlu0 %556  ;;  %v562_v7 = vpop.permute.xlu1 %561 }
  0xfb   : > { %938 = vmatpush3.msra.mxu1 %v1344_v2 }
  0xfc   : > { %940 = vmatmul.mubr.msk.f32.vlgmr.msra.gmra.mxu1 %vm564_vm0, %v524_v62 }
 0x1ae   : > { %v637_v4 = vpop.f32.mrf.mxu0 }
 0x1af   : > { %v638_v5 = vadd.f32 %v637_v4, %v557_v1 }
 0x1b0   : > { %v639_v6 = vpop.f32.mrf.mxu0 }
 0x1b1   : > { %v726_v8 = vmin.f32 %v638_v5, 0.0  ;;  %v640_v9 = vadd.f32 %v639_v6, %v557_v1  ;;  %vm723_vm0 = vcmp.gt.f32.partialorder %v638_v5, 0.0 }
 0x1b2   : > { %v643_v10 = vpop.f32.mrf.mxu0 }
 0x1b3   : > { %v729_v11 = vmul.f32 1.442695, %v726_v8  ;;  %v727_v12 = vmin.f32 %v640_v9, 0.0  ;;  %v644_v13 = vadd.f32 %v643_v10, %v562_v7  ;;  %vm724_vm2 = vcmp.gt.f32.partialorder %v640_v9, 0.0 }
 0x1b4   : > { %v645_v14 = vpop.f32.mrf.mxu0 }
 0x1b5   : > { %1024 = vpow2.f32 %v729_v11  ;;  %v731_v15 = vmul.f32 1.442695, %v727_v12  ;;  %v741_v16 = vmul.f32 0.5, %v644_v13  ;;  %v646_v17 = vadd.f32 %v645_v14, %v562_v7 }
 0x1b7   : > { %1026 = vpow2.f32 %v731_v15  ;;  %v742_v2 = vmul.f32 0.5, %v646_v17 }
 0x1b8   : > { %1028 = vtanh.f32 %v741_v16 }
 0x1b9   : > { %1030 = vtanh.f32 %v742_v2 }
 0x1bc   : > { %v941_v18 = vpop.f32.mrf.mxu1 }
 0x1bd   : > { %v720_v19 = vadd.f32 %v941_v18, %v562_v7 }
 0x1be   : > { %v714_v20 = vpop.f32.mrf.mxu1 }
 0x1bf   : > { %v743_v21 = vmul.f32 0.5, %v720_v19  ;;  %v715_v22 = vadd.f32 %v714_v20, %v557_v1 }
 0x1c1   : > { %1032 = vtanh.f32 %v743_v21  ;;  %v728_v23 = vmin.f32 %v715_v22, 0.0  ;;  %vm725_vm3 = vcmp.gt.f32.partialorder %v715_v22, 0.0 }
 0x1c2   : > { %v1025_v24 = vpop.eup %1024 }
 0x1c3   : > { %v733_v25 = vmul.f32 1.442695, %v728_v23  ;;  %v902_v28 = vadd.f32 -1.0, %v1025_v24 }
 0x1c4   : > { %v1027_v26 = vpop.eup %1026 }
 0x1c5   : > { %v1029_v27 = vpop.eup %1028  ;;  %1034 = vpow2.f32 %v733_v25  ;;  %v903_v30 = vadd.f32 -1.0, %v1027_v26  ;;  %v738_v34 = vsel %vm723_vm0, %v638_v5, %v902_v28 }
 0x1c6   : > { %v1031_v29 = vpop.eup %1030  ;;  %v747_v31 = vmul.f32 0.5, %v1029_v27 }
 0x1c7   : > { %v748_v32 = vmul.f32 0.5, %v1031_v29  ;;  %v739_v36 = vsel %vm724_vm2, %v640_v9, %v903_v30 }
 0x1c8   : > { %v750_v33 = vadd.f32 0.5, %v747_v31 }
 0x1c9   : > { %v751_v35 = vadd.f32 0.5, %v748_v32 }
 0x1ca   : > { %v753_v37 = vmul.f32 %v750_v33, %v738_v34 }
 0x1cb   : > { %v754_v38 = vmul.f32 %v751_v35, %v739_v36 }
 0x1cc   : > { %756 = vst [vmem:[%s284_s12] sm:$0xff] %v753_v37 }
 0x1cd   : > { %757 = vst [vmem:[%s284_s12 + $0x8] sm:$0xff] %v754_v38 }
 0x1ce   : > { %v1033_v39 = vpop.eup %1032 }
 0x1cf   : > { %v749_v40 = vmul.f32 0.5, %v1033_v39 }
 0x1d1   : > { %v752_v43 = vadd.f32 0.5, %v749_v40 }
 0x1d2   : > { %v1035_v41 = vpop.eup %1034 }
 0x1d3   : > { %v904_v42 = vadd.f32 -1.0, %v1035_v41 }
 0x1d5   : > { %v740_v44 = vsel %vm725_vm3, %v715_v22, %v904_v42 }
 0x1d6   : > { %v755_v45 = vmul.f32 %v752_v43, %v740_v44 }
 0x1d8   : > { %758 = vst [vmem:[%s284_s12 + $0x10] sm:$0xff] %v755_v45 }
 0x1d9   : > { %1106 = shalt.err (!%p1103_p5)
}
 0x1da   : > { %s1107_s26 = scalar_lea.hbm %s774_s25, 384  ;;  %s1111_s8 = scalar_lea.hbm %s1442_s4, 768 }
 0x1db   : > { %p1108_p6 = scmp.ne.s32.totalorder %s774_s25, %s1107_s26  ;;  %p1112_p1 = scmp.lt.s32.totalorder %s774_s25, %s1442_s4 }
 0x1dc   : > { %p1113_p10 = scmp.lt.s32.totalorder %s1111_s8, %s1107_s26 }
 0x1dd   : > { %p1109_p7 = pnand %p1108_p6, %p1268_p9 }
 0x1de   : > { %p1114_p8 = por %p1113_p10, %p1112_p1 }
 0x1df   : > { %p1110_p12 = pneg %p1109_p7 }
 0x1e1   : > { %p1115_p0 = pnand %p1114_p8, %p1110_p12 }
 0x1e3   : > { %1118 = shalt.err (!%p1115_p0)
}
 0x1e4   : > { %949 = dma.vmem_to_hbm [thread:$0]  (%p1268_p9), %s777_s21, 384, %s774_s25, %s760_s14  }
 0x1e5 PF: > { %s788_s10 = sand.u32 1, %s1157_s15   ;;  %p1451_p2 = scmp.ge.s32.totalorder %s1177_s20, 2 }
 0x1e6   : > { %s789_s12 = scalar_lea.sflag [#allocation5], %s788_s10 }
 0x1e7   : > { %p959_p13 = pnand %p1451_p2, %p1275_p11 }
 0x1e9   : > { %p960_p3 = pneg %p959_p13 }
 0x1eb   : > { %1152 = dma.done.wait (%p960_p3), %s789_s12, 384  }
 0x1ec   : > { %1154 = vsyncadd (%p960_p3), %s789_s12, 4294966912  ;;  %s23_s20 = sadd.s32 1, %s1177_s20   ;;  %s1452_s15 = smov %s1161_s16 }
 0x1ed   : > { %p20_p4 = scmp.ge.s32.totalorder %s23_s20, 4   ;;  %s1453_s16 = smov %s1165_s17 }
 0x1ee   : > { %s1454_s17 = smov %s1273_s29  ;;  %s1455_s18 = smov %s1173_s19 }
 0x1ef   : > { %s1456_s19 = smov %s1458_s23  ;;  %22 = sbr.rel (!%p20_p4) target bundleno = 10 (0xa), region = 94 }
 0x1f4   :  { %794 = vsyncpa [#allocation4], 1 }
 0x1f5   :  { %796 = vsyncpa [#allocation4 + $0x1], 1 }
 0x1f6   :  { %797 = vsyncpa [#allocation7], 1 }
 0x1f7   :  { %799 = vsyncpa [#allocation7 + $0x1], 1 }
 0x1f8   :  { %800 = vsyncpa [#allocation5], 1 }
 0x1f9   :  { %802 = vsyncpa [#allocation5 + $0x1], 1 }

</bundles_post_ra>
